<compile_context>
chip_gen: v6e
topology: v6e:2x2x1
jax: 0.10.0
libtpu: 0.0.40
codegen_flags: <defaults>
</compile_context>

<pallas_src>
import functools
import math

import jax
import jax.numpy as jnp
from jax import lax
from jax.experimental import pallas as pl
from jax.experimental.pallas import tpu as pltpu

EPS = 1e-5          # PyTorch BatchNorm1d default eps
LANES = 128         # TPU lane width


def _rup(v, m):
    return (v + m - 1) // m * m


# ----------------------------------------------------------------------------
# Pass 1: conv1 ('same', no bias) in phase-decimated layout + masked partial
#         BN1 statistics.  One grid step == one batch record.
# ----------------------------------------------------------------------------
def _pass1_kernel(*refs, ds, n_groups, cout, pseg, spx, L,
                  group_phase, group_start, group_rows):
    f32 = jnp.float32
    xd = refs[:ds]                              # ds x (Cin, XSEG) bf16
    wg = refs[ds:ds + n_groups]                 # grouped weights (G*Cout, Cin) bf16
    ph_ref, st_ref = refs[ds + n_groups], refs[ds + n_groups + 1]

    # conv1: one MXU matmul per distinct (input-phase, column-offset) group;
    # every RHS slice is materialized exactly once.
    acc = [jnp.zeros((cout, pseg), f32) for _ in range(ds)]
    for g in range(n_groups):
        m, s = group_phase[g], group_start[g]
        rhs = xd[m][:, s:s + pseg]                              # (Cin, PSEG)
        res = jnp.dot(wg[g][...], rhs, preferred_element_type=f32)
        for gi, r in enumerate(group_rows[g]):
            acc[r] = acc[r] + res[gi * cout:(gi + 1) * cout, :]

    # masked store + single-pass BN1 partials (sum / sum-of-squares), f32.
    a_idx = lax.broadcasted_iota(jnp.int32, (1, pseg), 1)
    ssum = jnp.zeros((cout, 1), f32)
    ssq = jnp.zeros((cout, 1), f32)
    for r in range(ds):
        lpos = a_idx * ds + (r - spx)
        mask = ((lpos >= 0) & (lpos < L)).astype(f32)           # (1, PSEG)
        v = acc[r] * mask
        ph_ref[r, :, :] = v
        ssum = ssum + jnp.sum(v, axis=1, keepdims=True)
        ssq = ssq + jnp.sum(v * v, axis=1, keepdims=True)
    lane = lax.broadcasted_iota(jnp.int32, (1, LANES), 1)
    st_ref[...] = (jnp.where(lane == 0, ssum, 0.0)
                   + jnp.where(lane == 1, ssq, 0.0))


# ----------------------------------------------------------------------------
# Pass 2: BN1 normalize + ReLU (+Dropout==identity) -> strided conv2 in phase
#         layout ; skip: 'same' conv on the max-pooled y ; merge ; BN2 partials.
# ----------------------------------------------------------------------------
def _pass2_kernel(ph_ref, y_ref, bn1_ref, w2_ref, wy_ref,
                  xy_ref, yo_ref, st_ref, *, ds, K, cout, pseg, oseg,
                  spx, L, L_out):
    f32 = jnp.float32
    mean1 = bn1_ref[:, 0:1]                     # (Cout, 1)
    inv1 = bn1_ref[:, 1:2]

    # BN1 + ReLU + re-apply the zero padding of the strided conv's input.
    # TODO(synk): nn.Dropout is stochastic in training; identity (eval) here.
    a_idx = lax.broadcasted_iota(jnp.int32, (1, pseg), 1)
    phm = []
    for r in range(ds):
        lpos = a_idx * ds + (r - spx)
        mask = ((lpos >= 0) & (lpos < L)).astype(f32)
        v = jnp.maximum((ph_ref[r, :, :] - mean1) * inv1, 0.0) * mask
        phm.append(v.astype(jnp.bfloat16))

    # conv2 (stride ds, folded into the phase layout): K MXU matmuls.
    acc2 = jnp.zeros((cout, oseg), f32)
    for k in range(K):
        r, u = k % ds, k // ds
        acc2 = acc2 + jnp.dot(w2_ref[k], phm[r][:, u:u + oseg],
                              preferred_element_type=f32)

    # skip path: 'same' conv on the pooled y (pool done f32 in the wrapper).
    accy = jnp.zeros((cout, oseg), f32)
    for k in range(K):
        accy = accy + jnp.dot(wy_ref[k], y_ref[:, k:k + oseg],
                              preferred_element_type=f32)

    xy = acc2 + accy
    yo_ref[...] = acc2                          # y_out = raw conv2 output
    xy_ref[...] = xy                            # pre-BN2 merge

    # BN2 partial statistics over the valid output columns only.
    o_idx = lax.broadcasted_iota(jnp.int32, (1, oseg), 1)
    m2 = (o_idx < L_out).astype(f32)
    xym = xy * m2
    lane = lax.broadcasted_iota(jnp.int32, (1, LANES), 1)
    st_ref[...] = (jnp.where(lane == 0, jnp.sum(xym, axis=1, keepdims=True), 0.0)
                   + jnp.where(lane == 1, jnp.sum(xym * xym, axis=1, keepdims=True), 0.0))


# ----------------------------------------------------------------------------
# Wrapper: static geometry + lane-dense slab layout + two pallas_calls.
# ----------------------------------------------------------------------------
def resblock_forward(x, y, w1, w2, wy, *, input_dim, out_dim, kernel_size):
    N, Cin, L = (int(d) for d in x.shape)
    assert L == input_dim
    Cout, Cin_w, K = (int(d) for d in w1.shape)
    assert Cin_w == Cin and K == kernel_size and K % 2 == 1, "odd kernel_size only"
    ds = input_dim // out_dim
    assert ds >= 1, "Size of input should always decrease."
    pad_same = (K - 1) // 2
    f32, bf16 = jnp.float32, jnp.bfloat16

    # -------- static geometry (mirrors the PyTorch module) ------------------
    Lp1 = L + 2 * pad_same
    spx = max(int(math.ceil(0.5 * (L // out_dim * (out_dim - 1) - L + K))), 0)
    Lp2 = L + 2 * spx
    L_out = (Lp2 - K) // ds + 1

    Ly = int(y.shape[-1])
    if ds > 1:
        sp = max(int(math.ceil(0.5 * (Ly // out_dim * (out_dim - 1) - Ly + ds))), 0)
        L_pool = (Ly + 2 * sp - ds) // ds + 1
    else:
        sp, L_pool = 0, Ly
    assert L_pool == L_out, "branch lengths must match (as in the PyTorch model)"

    u_left = -(-spx // ds)                     # ceil(spx / ds)
    u2_max = (K - 1) // ds
    B = -(-Lp1 // ds)                          # ceil(Lp1 / ds)
    A_stats = (L - 1 + spx) // ds + 1          # columns that can hold a valid x1 sample

    # per-record lane-aligned widths (one record per grid step)
    OSEG = _rup(L_out, LANES)
    PSEG = _rup(max(A_stats, OSEG + u2_max), LANES)
    YSEG = _rup(OSEG + (K - 1), LANES)

    # conv1 tap groups: distinct (input phase, column offset) pairs
    t_lo, t_hi = -spx, (ds - 1) - spx + (K - 1)
    group_phase, group_start, group_rows, wg_arrays = [], [], [], []
    for t in range(t_lo, t_hi + 1):
        rs = tuple(r for r in range(ds) if 0 <= t + spx - r < K)
        group_phase.append(t % ds)
        group_start.append(u_left + t // ds)
        group_rows.append(rs)
        wg_arrays.append(jnp.concatenate(
            [w1[:, :, t + spx - r] for r in rs], axis=0).astype(bf16))
    n_groups = len(group_rows)
    start_max = max(group_start)
    XSEG = _rup(max(PSEG + start_max, u_left + B), LANES)

    # -------- layout glue: phase-decimated x slabs, pooled-y slab -----------
    xpad1 = jnp.pad(x, ((0, 0), (0, 0), (pad_same, pad_same)))
    xd_list = []
    for m in range(ds):
        dec = xpad1[:, :, m::ds]                              # (N, Cin, b_m)
        b_m = int(dec.shape[-1])
        seg = jnp.zeros((N, Cin, XSEG), x.dtype).at[:, :, u_left:u_left + b_m].set(dec)
        xd_list.append(jnp.transpose(seg, (1, 0, 2)).reshape(Cin, N * XSEG).astype(bf16))

    if ds > 1:                                  # max-pool in f32 (v5e friendly)
        y_p = jnp.pad(y, ((0, 0), (0, 0), (sp, sp)))
        ypool = lax.reduce_window(y_p, -jnp.inf, lax.max,
                                  (1, 1, ds), (1, 1, ds), 'VALID')
    else:
        ypool = y
    yseg = jnp.zeros((N, Cin, YSEG), y.dtype).at[:, :, pad_same:pad_same + L_pool].set(ypool)
    y_slab = jnp.transpose(yseg, (1, 0, 2)).reshape(Cin, N * YSEG).astype(bf16)

    w2_r = jnp.transpose(w2, (2, 0, 1)).astype(bf16)          # (K, Cout, Cout)
    wy_r = jnp.transpose(wy, (2, 0, 1)).astype(bf16)          # (K, Cout, Cin)

    # ---------------- pass 1: conv1 + BN1 partial statistics ----------------
    p1 = functools.partial(
        _pass1_kernel, ds=ds, n_groups=n_groups, cout=Cout, pseg=PSEG,
        spx=spx, L=L, group_phase=tuple(group_phase),
        group_start=tuple(group_start), group_rows=tuple(group_rows))

    p1_in_specs = (
        [pl.BlockSpec((Cin, XSEG), lambda i: (0, i)) for _ in range(ds)]
        + [pl.BlockSpec(tuple(int(d) for d in w.shape), lambda i: (0, 0))
           for w in wg_arrays])
    p1_out_shape = (
        jax.ShapeDtypeStruct((ds, Cout, N * PSEG), f32),
        jax.ShapeDtypeStruct((N, Cout, LANES), f32))
    p1_out_specs = (
        pl.BlockSpec((ds, Cout, PSEG), lambda i: (0, 0, i)),
        pl.BlockSpec((None, Cout, LANES), lambda i: (i, 0, 0)))

    vmem1 = (2 * (ds * Cin * XSEG * 2 + sum(int(w.size) * 2 for w in wg_arrays)
                  + ds * Cout * PSEG * 4 + Cout * LANES * 4)
             + 2 * ds * Cout * PSEG * 4 + (4 << 20))
    cost1 = pl.CostEstimate(
        flops=2 * N * sum(len(rs) for rs in group_rows) * Cout * Cin * PSEG,
        transcendentals=0,
        bytes_accessed=int(N * (ds * Cin * XSEG * 2 + ds * Cout * PSEG * 4)))

    ph, stats1 = pl.pallas_call(
        p1,
        grid=(N,),
        in_specs=p1_in_specs,
        out_shape=p1_out_shape,
        out_specs=p1_out_specs,
        compiler_params=pltpu.CompilerParams(
            dimension_semantics=("parallel",),
            vmem_limit_bytes=int(min(100 << 20, max(32 << 20, vmem1)))),
        cost_estimate=cost1,
    )(*xd_list, *wg_arrays)

    # tiny XLA reduce of the per-record partials -> per-channel BN1 stats
    n1 = float(N * L)
    sum1 = jnp.sum(stats1[:, :, 0], axis=0)
    sq1 = jnp.sum(stats1[:, :, 1], axis=0)
    mean1 = sum1 / n1
    var1 = jnp.maximum(sq1 / n1 - mean1 * mean1, 0.0)
    inv1 = lax.rsqrt(var1 + EPS)
    bn1 = jnp.zeros((Cout, LANES), f32).at[:, 0].set(mean1).at[:, 1].set(inv1)

    # -------- pass 2: BN1+ReLU -> conv2(stride ds) + skip conv + merge ------
    p2 = functools.partial(
        _pass2_kernel, ds=ds, K=K, cout=Cout, pseg=PSEG, oseg=OSEG,
        spx=spx, L=L, L_out=L_out)

    p2_in_specs = [
        pl.BlockSpec((ds, Cout, PSEG), lambda i: (0, 0, i)),
        pl.BlockSpec((Cin, YSEG), lambda i: (0, i)),
        pl.BlockSpec((Cout, LANES), lambda i: (0, 0)),
        pl.BlockSpec((K, Cout, Cout), lambda i: (0, 0, 0)),
        pl.BlockSpec((K, Cout, Cin), lambda i: (0, 0, 0)),
    ]
    p2_out_shape = (
        jax.ShapeDtypeStruct((Cout, N * OSEG), f32),
        jax.ShapeDtypeStruct((Cout, N * OSEG), f32),
        jax.ShapeDtypeStruct((N, Cout, LANES), f32))
    p2_out_specs = (
        pl.BlockSpec((Cout, OSEG), lambda i: (0, i)),
        pl.BlockSpec((Cout, OSEG), lambda i: (0, i)),
        pl.BlockSpec((None, Cout, LANES), lambda i: (i, 0, 0)))

    vmem2 = (2 * (ds * Cout * PSEG * 4 + Cin * YSEG * 2 + Cout * LANES * 4
                  + K * Cout * (Cout + Cin) * 2 + 2 * Cout * OSEG * 4
                  + Cout * LANES * 4)
             + ds * Cout * PSEG * 4 + (4 << 20))
    cost2 = pl.CostEstimate(
        flops=2 * N * K * Cout * (Cout + Cin) * OSEG,
        transcendentals=0,
        bytes_accessed=int(N * (ds * Cout * PSEG * 4 + Cin * YSEG * 2
                                + 2 * Cout * OSEG * 4)))

    xy_pre, y_out_slab, stats2 = pl.pallas_call(
        p2,
        grid=(N,),
        in_specs=p2_in_specs,
        out_shape=p2_out_shape,
        out_specs=p2_out_specs,
        compiler_params=pltpu.CompilerParams(
            dimension_semantics=("parallel",),
            vmem_limit_bytes=int(min(100 << 20, max(32 << 20, vmem2)))),
        cost_estimate=cost2,
    )(ph, y_slab, bn1, w2_r, wy_r)

    # -------- finalize: BN2 (batch stats) + ReLU, unpack to (N, Cout, L_out) -
    n2 = float(N * L_out)
    sum2 = jnp.sum(stats2[:, :, 0], axis=0)
    sq2 = jnp.sum(stats2[:, :, 1], axis=0)
    mean2 = sum2 / n2
    var2 = jnp.maximum(sq2 / n2 - mean2 * mean2, 0.0)
    inv2 = lax.rsqrt(var2 + EPS)

    def unpack(slab):                          # (Cout, N*OSEG) -> (N, Cout, L_out)
        seg = slab.reshape(Cout, N, OSEG)[:, :, :L_out]
        return jnp.transpose(seg, (1, 0, 2))

    xy_pre_ncl = unpack(xy_pre)
    y_out = unpack(y_out_slab)
    xy = jnp.maximum((xy_pre_ncl - mean2[None, :, None]) * inv2[None, :, None], 0.0)
    return xy, y_out


# ----------------------------------------------------------------------------
# Pure-JAX reference (lax.conv / reduce_window) for the correctness check.
# ----------------------------------------------------------------------------
def _conv1d(x, w, stride, pad):
    return lax.conv_general_dilated(
        x, w, window_strides=(stride,), padding=[(pad, pad)],
        dimension_numbers=('NCH', 'OIH', 'NCH'),
        precision=lax.Precision.HIGHEST)


def _bn_relu_ref(x):
    mean = jnp.mean(x, axis=(0, 2), keepdims=True)
    var = jnp.mean((x - mean) ** 2, axis=(0, 2), keepdims=True)
    return jnp.maximum((x - mean) / jnp.sqrt(var + EPS), 0.0)


def resblock_reference(x, y, w1, w2, wy, *, input_dim, out_dim, kernel_size,
                       quantize_hidden=False):
    K = kernel_size
    ds = input_dim // out_dim
    Ly = y.shape[-1]
    if ds > 1:
        sp = max(int(math.ceil(0.5 * (Ly // out_dim * (out_dim - 1) - Ly + ds))), 0)
        y_p = jnp.pad(y, ((0, 0), (0, 0), (sp, sp)))
        y_pool = lax.reduce_window(y_p, -jnp.inf, lax.max,
                                   (1, 1, ds), (1, 1, ds), 'VALID')
    else:
        y_pool = y
    y_skip = _conv1d(y_pool, wy, 1, (K - 1) // 2)

    x1 = _bn_relu_ref(_conv1d(x, w1, 1, (K - 1) // 2))
    if quantize_hidden:
        x1 = x1.astype(jnp.bfloat16).astype(jnp.float32)
    L1 = x1.shape[-1]
    spx = max(int(math.ceil(0.5 * (L1 // out_dim * (out_dim - 1) - L1 + K))), 0)
    x1p = jnp.pad(x1, ((0, 0), (0, 0), (spx, spx)))
    x2 = _conv1d(x1p, w2, ds, 0)

    xy = _bn_relu_ref(x2 + y_skip)
    return xy, x2


# ----------------------------------------------------------------------------
if __name__ == "__main__":
    N, Cin, Cout = 4, 4, 8
    input_dim, out_dim, K = 16, 8, 3

    key = jax.random.PRNGKey(0)
    k1, k2, k3, k4, k5 = jax.random.split(key, 5)
    x = jax.random.normal(k1, (N, Cin, input_dim), jnp.float32)
    y = jax.random.normal(k2, (N, Cin, input_dim), jnp.float32)
    w1 = jax.random.normal(k3, (Cout, Cin, K), jnp.float32) / math.sqrt(Cin * K)
    w2 = jax.random.normal(k4, (Cout, Cout, K), jnp.float32) / math.sqrt(Cout * K)
    wy = jax.random.normal(k5, (Cout, Cin, K), jnp.float32) / math.sqrt(Cin * K)

    # Quantize once to bf16 so the kernel (bf16 MXU operands) and the f32
    # reference see numerically identical inputs.
    q = lambda a: a.astype(jnp.bfloat16).astype(jnp.float32)
    xq, yq, w1q, w2q, wyq = map(q, (x, y, w1, w2, wy))

    xy, y_out = resblock_forward(
        xq, yq, w1q, w2q, wyq,
        input_dim=input_dim, out_dim=out_dim, kernel_size=K)
    jax.block_until_ready((xy, y_out))

    # Tight check: reference mirrors the kernel's bf16 matmul-operand precision.
    xy_rq, y_rq = resblock_reference(
        xq, yq, w1q, w2q, wyq,
        input_dim=input_dim, out_dim=out_dim, kernel_size=K,
        quantize_hidden=True)
    # Loose sanity check against pure-f32 PyTorch-style math.
    xy_rf, y_rf = resblock_reference(
        xq, yq, w1q, w2q, wyq,
        input_dim=input_dim, out_dim=out_dim, kernel_size=K,
        quantize_hidden=False)

    ok_tight = (bool(jnp.allclose(xy, xy_rq, atol=2e-3, rtol=2e-3)) and
                bool(jnp.allclose(y_out, y_rq, atol=2e-3, rtol=2e-3)))
    ok_f32 = (bool(jnp.allclose(xy, xy_rf, atol=5e-2, rtol=5e-2)) and
              bool(jnp.allclose(y_out, y_rf, atol=5e-2, rtol=5e-2)))
    if not (ok_tight and ok_f32):
        max_d1 = float(jnp.max(jnp.abs(xy - xy_rq)))
        max_d2 = float(jnp.max(jnp.abs(y_out - y_rq)))
        raise AssertionError(
            f"Pallas ResBlock kernel mismatch (max|xy|={max_d1}, max|y|={max_d2})")
    print("KERNEL_OK")
</pallas_src>

<mosaic_0001>
module attributes {stable_mosaic.version = 11 : i64} {
  func.func @_pass1_kernel(%arg0: i32, %arg1: memref<4x384xbf16, #tpu.memory_space<vmem>>, %arg2: memref<4x384xbf16, #tpu.memory_space<vmem>>, %arg3: memref<8x4xbf16, #tpu.memory_space<vmem>>, %arg4: memref<16x4xbf16, #tpu.memory_space<vmem>>, %arg5: memref<16x4xbf16, #tpu.memory_space<vmem>>, %arg6: memref<8x4xbf16, #tpu.memory_space<vmem>>, %arg7: memref<2x8x256xf32, #tpu.memory_space<vmem>>, %arg8: memref<1x8x128xf32, #tpu.memory_space<vmem>>) attributes {dimension_semantics = [#tpu.dimension_semantics<parallel>], iteration_bounds = array<i64: 4>, scalar_prefetch = 0 : i64, scratch_operands = 0 : i64, tpu.core_type = #tpu.core_type<tc>, window_params = [{transform_indices = @transform_0, window_bounds = array<i64: 4, 384>}, {transform_indices = @transform_1, window_bounds = array<i64: 4, 384>}, {pipeline_mode = #tpu.pipeline_mode<synchronous>, transform_indices = @transform_2, window_bounds = array<i64: 8, 4>}, {pipeline_mode = #tpu.pipeline_mode<synchronous>, transform_indices = @transform_3, window_bounds = array<i64: 16, 4>}, {pipeline_mode = #tpu.pipeline_mode<synchronous>, transform_indices = @transform_4, window_bounds = array<i64: 16, 4>}, {pipeline_mode = #tpu.pipeline_mode<synchronous>, transform_indices = @transform_5, window_bounds = array<i64: 8, 4>}, {transform_indices = @transform_6, window_bounds = array<i64: 2, 8, 256>}, {transform_indices = @transform_7, window_bounds = array<i64: 1, 8, 128>}]} {
    %cst = arith.constant 0.000000e+00 : f32
    %0 = vector.broadcast %cst : f32 to vector<8x256xf32>
    %cst_0 = arith.constant 0.000000e+00 : f32
    %1 = vector.broadcast %cst_0 : f32 to vector<8x256xf32>
    %c0 = arith.constant 0 : index
    %c0_1 = arith.constant 0 : index
    %2 = vector.load %arg2[%c0, %c0_1] : memref<4x384xbf16, #tpu.memory_space<vmem>>, vector<4x256xbf16>
    %c0_2 = arith.constant 0 : index
    %c0_3 = arith.constant 0 : index
    %3 = vector.load %arg3[%c0_2, %c0_3] : memref<8x4xbf16, #tpu.memory_space<vmem>>, vector<8x4xbf16>
    %cst_4 = arith.constant dense<0.000000e+00> : vector<8x256xf32>
    %4 = tpu.matmul %3, %2, %cst_4 {dimension_numbers = #tpu.dot_dimension_numbers<[1], [0], [0], [1], [0, 0, 1, 1], [], []>} : vector<8x4xbf16>, vector<4x256xbf16>, vector<8x256xf32> -> vector<8x256xf32>
    %5 = arith.addf %0, %4 : vector<8x256xf32>
    %c0_5 = arith.constant 0 : index
    %c1 = arith.constant 1 : index
    %6 = vector.load %arg1[%c0_5, %c1] : memref<4x384xbf16, #tpu.memory_space<vmem>>, vector<4x256xbf16>
    %c0_6 = arith.constant 0 : index
    %c0_7 = arith.constant 0 : index
    %7 = vector.load %arg4[%c0_6, %c0_7] : memref<16x4xbf16, #tpu.memory_space<vmem>>, vector<16x4xbf16>
    %cst_8 = arith.constant dense<0.000000e+00> : vector<16x256xf32>
    %8 = tpu.matmul %7, %6, %cst_8 {dimension_numbers = #tpu.dot_dimension_numbers<[1], [0], [0], [1], [0, 0, 1, 1], [], []>} : vector<16x4xbf16>, vector<4x256xbf16>, vector<16x256xf32> -> vector<16x256xf32>
    %9 = vector.extract_strided_slice %8 {offsets = [0, 0], sizes = [8, 256], strides = [1, 1]} : vector<16x256xf32> to vector<8x256xf32>
    %10 = arith.addf %5, %9 : vector<8x256xf32>
    %11 = vector.extract_strided_slice %8 {offsets = [8, 0], sizes = [8, 256], strides = [1, 1]} : vector<16x256xf32> to vector<8x256xf32>
    %12 = arith.addf %1, %11 : vector<8x256xf32>
    %c0_9 = arith.constant 0 : index
    %c1_10 = arith.constant 1 : index
    %13 = vector.load %arg2[%c0_9, %c1_10] : memref<4x384xbf16, #tpu.memory_space<vmem>>, vector<4x256xbf16>
    %c0_11 = arith.constant 0 : index
    %c0_12 = arith.constant 0 : index
    %14 = vector.load %arg5[%c0_11, %c0_12] : memref<16x4xbf16, #tpu.memory_space<vmem>>, vector<16x4xbf16>
    %cst_13 = arith.constant dense<0.000000e+00> : vector<16x256xf32>
    %15 = tpu.matmul %14, %13, %cst_13 {dimension_numbers = #tpu.dot_dimension_numbers<[1], [0], [0], [1], [0, 0, 1, 1], [], []>} : vector<16x4xbf16>, vector<4x256xbf16>, vector<16x256xf32> -> vector<16x256xf32>
    %16 = vector.extract_strided_slice %15 {offsets = [0, 0], sizes = [8, 256], strides = [1, 1]} : vector<16x256xf32> to vector<8x256xf32>
    %17 = arith.addf %10, %16 : vector<8x256xf32>
    %18 = vector.extract_strided_slice %15 {offsets = [8, 0], sizes = [8, 256], strides = [1, 1]} : vector<16x256xf32> to vector<8x256xf32>
    %19 = arith.addf %12, %18 : vector<8x256xf32>
    %c0_14 = arith.constant 0 : index
    %c2 = arith.constant 2 : index
    %20 = vector.load %arg1[%c0_14, %c2] : memref<4x384xbf16, #tpu.memory_space<vmem>>, vector<4x256xbf16>
    %c0_15 = arith.constant 0 : index
    %c0_16 = arith.constant 0 : index
    %21 = vector.load %arg6[%c0_15, %c0_16] : memref<8x4xbf16, #tpu.memory_space<vmem>>, vector<8x4xbf16>
    %cst_17 = arith.constant dense<0.000000e+00> : vector<8x256xf32>
    %22 = tpu.matmul %21, %20, %cst_17 {dimension_numbers = #tpu.dot_dimension_numbers<[1], [0], [0], [1], [0, 0, 1, 1], [], []>} : vector<8x4xbf16>, vector<4x256xbf16>, vector<8x256xf32> -> vector<8x256xf32>
    %23 = arith.addf %19, %22 : vector<8x256xf32>
    %24 = tpu.iota {dimensions = array<i32: 1>} : vector<1x256xi32>
    %cst_18 = arith.constant 0.000000e+00 : f32
    %25 = vector.broadcast %cst_18 : f32 to vector<8x1xf32>
    %cst_19 = arith.constant 0.000000e+00 : f32
    %26 = vector.broadcast %cst_19 : f32 to vector<8x1xf32>
    %c2_i32 = arith.constant 2 : i32
    %27 = vector.broadcast %c2_i32 : i32 to vector<1x256xi32>
    %28 = arith.muli %24, %27 : vector<1x256xi32>
    %c-1_i32 = arith.constant -1 : i32
    %29 = vector.broadcast %c-1_i32 : i32 to vector<1x256xi32>
    %30 = arith.addi %28, %29 : vector<1x256xi32>
    %c0_i32 = arith.constant 0 : i32
    %31 = vector.broadcast %c0_i32 : i32 to vector<1x256xi32>
    %32 = arith.cmpi sge, %30, %31 : vector<1x256xi32>
    %c16_i32 = arith.constant 16 : i32
    %33 = vector.broadcast %c16_i32 : i32 to vector<1x256xi32>
    %34 = arith.cmpi slt, %30, %33 : vector<1x256xi32>
    %35 = arith.andi %32, %34 : vector<1x256xi1>
    %36 = arith.extui %35 : vector<1x256xi1> to vector<1x256xi32>
    %37 = arith.sitofp %36 : vector<1x256xi32> to vector<1x256xf32>
    %38 = vector.broadcast %37 : vector<1x256xf32> to vector<8x256xf32>
    %39 = arith.mulf %17, %38 : vector<8x256xf32>
    %c0_20 = arith.constant 0 : index
    %c0_21 = arith.constant 0 : index
    %c0_22 = arith.constant 0 : index
    %40 = vector.load %arg7[%c0_20, %c0_21, %c0_22] : memref<2x8x256xf32, #tpu.memory_space<vmem>>, vector<1x8x256xf32>
    %41 = vector.shape_cast %40 : vector<1x8x256xf32> to vector<8x256xf32>
    %42 = vector.shape_cast %39 : vector<8x256xf32> to vector<1x8x256xf32>
    tpu.vector_store %arg7[%c0_20, %c0_21, %c0_22], %42 {strides = array<i32>} : memref<2x8x256xf32, #tpu.memory_space<vmem>>, vector<1x8x256xf32>,
    %cst_23 = arith.constant dense<0.000000e+00> : vector<8xf32>
    %43 = vector.multi_reduction <add>, %39, %cst_23 [1] : vector<8x256xf32> to vector<8xf32>
    %44 = vector.shape_cast %43 : vector<8xf32> to vector<8x1xf32>
    %45 = arith.addf %25, %44 : vector<8x1xf32>
    %46 = arith.mulf %39, %39 : vector<8x256xf32>
    %cst_24 = arith.constant dense<0.000000e+00> : vector<8xf32>
    %47 = vector.multi_reduction <add>, %46, %cst_24 [1] : vector<8x256xf32> to vector<8xf32>
    %48 = vector.shape_cast %47 : vector<8xf32> to vector<8x1xf32>
    %49 = arith.addf %26, %48 : vector<8x1xf32>
    %c2_i32_25 = arith.constant 2 : i32
    %50 = vector.broadcast %c2_i32_25 : i32 to vector<1x256xi32>
    %51 = arith.muli %24, %50 : vector<1x256xi32>
    %c0_i32_26 = arith.constant 0 : i32
    %52 = vector.broadcast %c0_i32_26 : i32 to vector<1x256xi32>
    %53 = arith.addi %51, %52 : vector<1x256xi32>
    %c0_i32_27 = arith.constant 0 : i32
    %54 = vector.broadcast %c0_i32_27 : i32 to vector<1x256xi32>
    %55 = arith.cmpi sge, %53, %54 : vector<1x256xi32>
    %c16_i32_28 = arith.constant 16 : i32
    %56 = vector.broadcast %c16_i32_28 : i32 to vector<1x256xi32>
    %57 = arith.cmpi slt, %53, %56 : vector<1x256xi32>
    %58 = arith.andi %55, %57 : vector<1x256xi1>
    %59 = arith.extui %58 : vector<1x256xi1> to vector<1x256xi32>
    %60 = arith.sitofp %59 : vector<1x256xi32> to vector<1x256xf32>
    %61 = vector.broadcast %60 : vector<1x256xf32> to vector<8x256xf32>
    %62 = arith.mulf %23, %61 : vector<8x256xf32>
    %c1_29 = arith.constant 1 : index
    %c0_30 = arith.constant 0 : index
    %c0_31 = arith.constant 0 : index
    %63 = vector.load %arg7[%c1_29, %c0_30, %c0_31] : memref<2x8x256xf32, #tpu.memory_space<vmem>>, vector<1x8x256xf32>
    %64 = vector.shape_cast %63 : vector<1x8x256xf32> to vector<8x256xf32>
    %65 = vector.shape_cast %62 : vector<8x256xf32> to vector<1x8x256xf32>
    tpu.vector_store %arg7[%c1_29, %c0_30, %c0_31], %65 {strides = array<i32>} : memref<2x8x256xf32, #tpu.memory_space<vmem>>, vector<1x8x256xf32>,
    %cst_32 = arith.constant dense<0.000000e+00> : vector<8xf32>
    %66 = vector.multi_reduction <add>, %62, %cst_32 [1] : vector<8x256xf32> to vector<8xf32>
    %67 = vector.shape_cast %66 : vector<8xf32> to vector<8x1xf32>
    %68 = arith.addf %45, %67 : vector<8x1xf32>
    %69 = arith.mulf %62, %62 : vector<8x256xf32>
    %cst_33 = arith.constant dense<0.000000e+00> : vector<8xf32>
    %70 = vector.multi_reduction <add>, %69, %cst_33 [1] : vector<8x256xf32> to vector<8xf32>
    %71 = vector.shape_cast %70 : vector<8xf32> to vector<8x1xf32>
    %72 = arith.addf %49, %71 : vector<8x1xf32>
    %73 = tpu.iota {dimensions = array<i32: 1>} : vector<1x128xi32>
    %c0_i32_34 = arith.constant 0 : i32
    %74 = vector.broadcast %c0_i32_34 : i32 to vector<1x128xi32>
    %75 = arith.cmpi eq, %73, %74 : vector<1x128xi32>
    %cst_35 = arith.constant 0.000000e+00 : f32
    %76 = vector.shape_cast %75 : vector<1x128xi1> to vector<1x128xi1>
    %77 = vector.broadcast %76 : vector<1x128xi1> to vector<8x128xi1>
    %78 = vector.shape_cast %68 : vector<8x1xf32> to vector<8x1xf32>
    %79 = vector.broadcast %78 : vector<8x1xf32> to vector<8x128xf32>
    %80 = vector.broadcast %cst_35 : f32 to vector<8x128xf32>
    %81 = arith.select %77, %79, %80 : vector<8x128xi1>, vector<8x128xf32>
    %c1_i32 = arith.constant 1 : i32
    %82 = vector.broadcast %c1_i32 : i32 to vector<1x128xi32>
    %83 = arith.cmpi eq, %73, %82 : vector<1x128xi32>
    %cst_36 = arith.constant 0.000000e+00 : f32
    %84 = vector.shape_cast %83 : vector<1x128xi1> to vector<1x128xi1>
    %85 = vector.broadcast %84 : vector<1x128xi1> to vector<8x128xi1>
    %86 = vector.shape_cast %72 : vector<8x1xf32> to vector<8x1xf32>
    %87 = vector.broadcast %86 : vector<8x1xf32> to vector<8x128xf32>
    %88 = vector.broadcast %cst_36 : f32 to vector<8x128xf32>
    %89 = arith.select %85, %87, %88 : vector<8x128xi1>, vector<8x128xf32>
    %90 = arith.addf %81, %89 : vector<8x128xf32>
    %c0_37 = arith.constant 0 : index
    %c0_38 = arith.constant 0 : index
    %c0_39 = arith.constant 0 : index
    %91 = vector.load %arg8[%c0_37, %c0_38, %c0_39] : memref<1x8x128xf32, #tpu.memory_space<vmem>>, vector<1x8x128xf32>
    %92 = vector.shape_cast %91 : vector<1x8x128xf32> to vector<8x128xf32>
    %93 = vector.shape_cast %90 : vector<8x128xf32> to vector<1x8x128xf32>
    tpu.vector_store %arg8[%c0_37, %c0_38, %c0_39], %93 {strides = array<i32>} : memref<1x8x128xf32, #tpu.memory_space<vmem>>, vector<1x8x128xf32>,
    return
  }
  func.func @transform_0(%arg0: i32) -> (i32, i32) {
    %c0_i32 = arith.constant 0 : i32
    %c0_i32_0 = arith.constant 0 : i32
    return %c0_i32, %arg0 : i32, i32
  }
  func.func @transform_1(%arg0: i32) -> (i32, i32) {
    %c0_i32 = arith.constant 0 : i32
    %c0_i32_0 = arith.constant 0 : i32
    return %c0_i32, %arg0 : i32, i32
  }
  func.func @transform_2(%arg0: i32) -> (i32, i32) {
    %c0_i32 = arith.constant 0 : i32
    %c0_i32_0 = arith.constant 0 : i32
    %c0_i32_1 = arith.constant 0 : i32
    return %c0_i32, %c0_i32_0 : i32, i32
  }
  func.func @transform_3(%arg0: i32) -> (i32, i32) {
    %c0_i32 = arith.constant 0 : i32
    %c0_i32_0 = arith.constant 0 : i32
    %c0_i32_1 = arith.constant 0 : i32
    return %c0_i32, %c0_i32_0 : i32, i32
  }
  func.func @transform_4(%arg0: i32) -> (i32, i32) {
    %c0_i32 = arith.constant 0 : i32
    %c0_i32_0 = arith.constant 0 : i32
    %c0_i32_1 = arith.constant 0 : i32
    return %c0_i32, %c0_i32_0 : i32, i32
  }
  func.func @transform_5(%arg0: i32) -> (i32, i32) {
    %c0_i32 = arith.constant 0 : i32
    %c0_i32_0 = arith.constant 0 : i32
    %c0_i32_1 = arith.constant 0 : i32
    return %c0_i32, %c0_i32_0 : i32, i32
  }
  func.func @transform_6(%arg0: i32) -> (i32, i32, i32) {
    %c0_i32 = arith.constant 0 : i32
    %c0_i32_0 = arith.constant 0 : i32
    %c0_i32_1 = arith.constant 0 : i32
    return %c0_i32, %c0_i32_0, %arg0 : i32, i32, i32
  }
  func.func @transform_7(%arg0: i32) -> (i32, i32, i32) {
    %c0_i32 = arith.constant 0 : i32
    %c0_i32_0 = arith.constant 0 : i32
    %c0_i32_1 = arith.constant 0 : i32
    return %arg0, %c0_i32, %c0_i32_0 : i32, i32, i32
  }
}

</mosaic_0001>

<bundles_post_ra>
// kernel: tpu_custom_call.1
= control target key start
LH: loop header
LB: loop body
LE: loop exit
PB: predicated region body
PF: predicated region fallthrough
CT: control target
= control target key end

     0   :  { %13 = vsyncpa [#allocation3], 0  ;;  %s1344_s0 = inlined_call_operand.vmem [shape: bf16[4,1536], index: 0, kind: input, shape index: {}]   ;;  %s1345_s1 = inlined_call_operand.hbm [shape: bf16[4,1536], index: 1, kind: input, shape index: {}]   ;;  %s1346_s2 = inlined_call_operand.vmem [shape: bf16[8,4], index: 2, kind: input, shape index: {}]   ;;  %s1347_s3 = inlined_call_operand.vmem [shape: bf16[16,4], index: 3, kind: input, shape index: {}]   ;;  %s1348_s4 = inlined_call_operand.vmem [shape: bf16[16,4], index: 4, kind: input, shape index: {}]   ;;  %s1349_s5 = inlined_call_operand.vmem [shape: bf16[8,4], index: 5, kind: input, shape index: {}]   ;;  %s1350_s6 = inlined_call_operand.hbm [shape: f32[2,8,1024], index: 6, kind: output, shape index: {0}]   ;;  %s1351_s7 = inlined_call_operand.hbm [shape: f32[4,8,128], index: 7, kind: output, shape index: {1}]  }
   0x1   :  { %15 = vsyncpa [#allocation3 + $0x1], 0 }
   0x2   :  { %16 = vsyncpa [#allocation4], 0 }
   0x3   :  { %18 = vsyncpa [#allocation4 + $0x1], 0 }
   0x4   :  { %19 = vsyncpa [#allocation7], 0 }
   0x5   :  { %21 = vsyncpa [#allocation7 + $0x1], 0  ;;  %s1141_s24 = smov 0   ;;  %s1143_s25 = smov 0  }
   0x6   :  { %s1145_s26 = smov 0   ;;  %s1147_s27 = smov 0  }
   0x7 LB: > { %s1162_s28 = sadd.s32 4294967295, %s1088_s27   ;;  %s866_s29 = sadd.s32 4294967294, %s1088_s27   ;;  %s1088_s27 = sphi %s1147_s27, %s1368_s27   ;;  %s1084_s26 = sphi %s1145_s26, %s1367_s26   ;;  %s1080_s25 = sphi %s1143_s25, %s1366_s25   ;;  %s1076_s24 = sphi %s1141_s24, %s1365_s24  }
   0x8   : > { %s1166_s30 = sadd.s32 1, %s1088_s27   ;;  %s60_s8 = sadd.s32 1, %s1084_s26 }
   0x9   : > { %s57_s9 = ssub.s32 %s1088_s27, %s1166_s30  ;;  %p67_p0 = scmp.ne.s32.totalorder %s1084_s26, %s1080_s25 }
   0xa   : > { %p58_p1 = scmp.eq.s32.totalorder %s57_s9, 0  ;;  %p68_p2 = scmp.eq.s32.totalorder %s1088_s27, 0 }
   0xb   : > { %p73_p3 = scmp.ne.s32.totalorder %s1080_s25, %s1076_s24  ;;  %p74_p4 = scmp.eq.s32.totalorder %s1162_s28, 0 }
   0xc   : > { %s1178_s10 = scalar_select %p58_p1, %s1084_s26, %s60_s8  }
   0xd   : > { %p69_p5 = por %p68_p2, %p67_p0  ;;  %p1180_p6 = por %p74_p4, %p73_p3 }
   0xe   : > { %1354 = sst [smem:[#allocation11_spill]] %s1178_s10  ;;  %p181_p7 = scmp.eq.s32.totalorder %s1162_s28, 3 }
   0xf   : > { %s1355_s11 = scalar_select %p1180_p6, 1, 0 }
  0x10   : > { %p187_p8 = scmp.eq.s32.totalorder %s866_s29, 3  ;;  %p919_p9 = scmp.lt.s32.totalorder %s1088_s27, 4 }
  0x11   : > { %p1186_p10 = por %p181_p7, %p67_p0  ;;  %s254_s14 = sand.u32 1, %s1084_s26  }
  0x12   : > { %p1190_p11 = por %p187_p8, %p73_p3  ;;  %s898_s15 = smul.u32 96, %s1088_s27 }
  0x13   : > { %s1356_s12 = scalar_select %p1186_p10, 1, 0 }
  0x14   : > { %s1357_s13 = scalar_select %p1190_p11, 1, 0 }
  0x15   : > { %s900_s16 = smul.u32 6, %s254_s14  ;;  %s1199_s19 = scalar_lea.hbm %s1345_s1, %s898_s15 }
  0x16   : > { %p1201_p12 = pnand %p919_p9, %p69_p5  ;;  %s255_s23 = scalar_lea.sflag [#allocation3], %s254_s14 }
  0x17   : > { %s258_s21 = scalar_lea.vmem [#allocation2], %s900_s16  ;;  %s966_s29 = scalar_lea.hbm %s1199_s19, 96 }
  0x18   : > { %s266_s22 = sshll.u32 %s258_s21, 4  ;;  %p967_p1 = scmp.ne.s32.totalorder %s1199_s19, %s966_s29  ;;  %s267_s22 = int_to_ptr.vmem [resolvable:$true] %s266_s22 }
  0x19   : > { %p968_p2 = pneg %p1201_p12  ;;  %s971_s15 = scalar_lea.hbm %s1345_s1, 384 }
  0x1a   : > { %p972_p5 = scmp.lt.s32.totalorder %s1199_s19, %s1345_s1  ;;  %p973_p7 = scmp.lt.s32.totalorder %s971_s15, %s966_s29 }
  0x1b   : > { %p969_p3 = pnand %p968_p2, %p967_p1 }
  0x1c   : > { %p974_p8 = por %p973_p7, %p972_p5 }
  0x1d   : > { %p970_p4 = pneg %p969_p3 }
  0x1f   : > { %p975_p9 = pnand %p974_p8, %p970_p4 }
  0x21   : > { %978 = shalt.err (!%p975_p9)
}
  0x22   : > { %s979_s16 = scalar_lea.vmem %s267_s22, 96  ;;  %s1090_s14 = smov [#allocation2]  }
  0x23   : > { %p980_p13 = scmp.ne.s32.totalorder %s267_s22, %s979_s16  ;;  %s984_s21 = sshll.u32 %s1090_s14, 4  ;;  %s985_s21 = int_to_ptr.vmem [resolvable:$false] %s984_s21 }
  0x24   : > { %s986_s10 = scalar_lea.vmem %s985_s21, 192  ;;  %p987_p1 = scmp.lt.s32.totalorder %s267_s22, %s985_s21 }
  0x25   : > { %p982_p0 = pnand %p980_p13, %p968_p2  ;;  %p988_p3 = scmp.lt.s32.totalorder %s986_s10, %s979_s16 }
  0x27   : > { %p983_p11 = pneg %p982_p0  ;;  %p989_p10 = por %p988_p3, %p987_p1 }
  0x29   : > { %p990_p6 = pnand %p989_p10, %p983_p11 }
  0x2b   : > { %993 = shalt.err (!%p990_p6)
}
  0x2c   : > { %911 = dma.hbm_to_vmem [thread:$0]  (!%p1201_p12), %s1199_s19, 96, %s267_s22, %s255_s23  }
  0x2d   : > { %p1359_p4 = scmp.lt.s32.totalorder %s1088_s27, 5  ;;  %p1360_p5 = scmp.ge.s32.totalorder %s1088_s27, 1 }
  0x2f   : > { %p272_p7 = pnand %p1360_p5, %p1359_p4 }
  0x30   : > { %s1226_s29 = sand.u32 (!%p272_p7), 1, %s1080_s25   ;;  %p1361_p6 = scmp.ne.s32.totalorder (!%p272_p7), %s1355_s11, 0 }
  0x31   : > { %275 = sbr.rel (%p272_p7) target bundleno = 562 (0x232), region = 44  ;;  %s278_s8 = scalar_lea.sflag (!%p272_p7), [#allocation3], %s1226_s29 }
  0x32   : > { %s901_s10 = smul.u32 (!%p272_p7), 6, %s1226_s29 }
  0x34   : > { %s281_s9 = scalar_lea.vmem (!%p272_p7), [#allocation2], %s901_s10 }
  0x36   : > { %1063 = dma.done.wait (%p1361_p6), %s278_s8, 96  }
  0x37   : > { %1065 = vsyncadd (%p1361_p6), %s278_s8, 4294967200  ;;  %s322_s19 = smul.u32 3, %s1162_s28  ;;  %v346_v0 = vlaneseq  ;;  %v1091_v1 = vmov 1983009808   ;;  %vm371_vm0 = vcmask 1041408   ;;  %v1092_v6 = vmov 0  }
  0x38   : > { %v344_v2 = vunpack.c.l.s4 %v1091_v1  ;;  %410 = vmatprep.mubr.bf16.mxu0 %v1092_v6  ;;  %471 = vmatprep.mubr.bf16.mxu1 %v1092_v6  ;;  %v877_v7 = vld.sshfl [vmem:[%s281_s9] sm:$0x33 pattern:$0x76325410]  ;;  %s1093_s15 = smov 127   ;;  %vm367_vm1 = vcmask 31744  }
  0x39   : > { %p323_p10 = scmp.lt.s32.totalorder %s322_s19, 11  ;;  %v347_v3 = vshrl.u32 %v346_v0, 7  ;;  %v482_v9 = vld [vmem:[%s281_s9] sm:$0x3f]  ;;  %v429_v10 = vcombine.high %v877_v7, %v877_v7  ;;  %v434_v13 = vsel %vm371_vm0, %v877_v7, 0  ;;  %s1094_s16 = smov 126  }
  0x3a   : > { %v345_v4 = vunpack.c.0.s8 %v344_v2  ;;  %v332_v17 = vld [vmem:[%s1346_s2] sm:$0xf]  ;;  %v491_v18 = vcombine.high %v482_v9, %v482_v9  ;;  %vm364_vm2 = vcmask 1039360   ;;  %vm596_vm3 = vcmask 1031168   ;;  %p1362_p12 = scmp.ne.s32.totalorder %s1356_s12, 0  ;;  %s1096_s21 = smov [#allocation5]  }
  0x3b   : > { %s1370_s19 = smov (!%p323_p10, %s322_s19), 11  ;;  %878 = vmatprep.subr.msk.bf16.mxu1 %vm371_vm0, %v429_v10  ;;  %v964_v33 = vld [vmem:[%s1347_s3] sm:$0xff]   ;;  %v1264_v51 = vand.u32 127, %v346_v0  ;;  %v1095_v63 = vmov 0.0   ;;  %s998_s10 = sshll.u32 %s1096_s21, 4  ;;  %s999_s10 = int_to_ptr.vmem [resolvable:$false] %s998_s10 }
  0x3c   : > { %v348_v5 = vsub.s32 %v345_v4, %v347_v3  ;;  %s873_s20 = sshll.u32 %s1370_s19, 1  ;;  %454 = vmatpush1.bf16.msra.mxu1 %v434_v13  ;;  %v965_v41 = vld [vmem:[%s1348_s4] sm:$0xff]   ;;  %s1000_s8 = scalar_lea.vmem %s999_s10, 1024 }
  0x3d   : > { %s326_s11 = scalar_lea.vmem %s1344_s0, %s873_s20  ;;  %v572_v46 = vld [vmem:[%s1349_s5] sm:$0xf]  ;;  %v653_v52 = vadd.s32 128, %v1264_v51  ;;  %v654_v53 = vmul.u32 2, %v1264_v51  ;;  %s871_s20 = sshll.u32 %s1226_s29, 5 }
  0x3e   : > { %v333_v8 = vld [vmem:[%s326_s11] sm:$0x3f]  ;;  %v498_v16 = vrot.slane %v482_v9, %v348_v5  ;;  %v505_v21 = vrot.slane %v491_v18, %v348_v5  ;;  %s1269_s22 = scalar_lea.vmem [#allocation5], %s871_s20 }
  0x3f   : > { %v349_v11 = vrot.slane %v333_v8, %v348_v5  ;;  %v342_v12 = vcombine.high %v333_v8, %v333_v8  ;;  %v571_v19 = vld [vmem:[%s326_s11] sm:$0x3f]  ;;  %879 = vmatmul.mubr.msk.bf16.vlgmr.msra.gmra.mxu1 %vm367_vm1, %v332_v17  ;;  %v655_v54 = vmul.u32 2, %v653_v52  ;;  %v656_v55 = vadd.s32 4294967295, %v654_v53  ;;  %s736_s23 = sshll.u32 %s1269_s22, 4  ;;  %s899_s11 = sshll.u32 %s1162_s28, 8  ;;  %s1276_s23 = int_to_ptr.vmem [resolvable:$true] %s736_s23 }
  0x40   : > { %v506_v20 = vcombine.high %v498_v16, %v498_v16  ;;  %640 = vmatprep.mubr.bf16.mxu1 %v1092_v6  ;;  %v581_v22 = vrot.slane %v571_v19, %v348_v5  ;;  %v574_v23 = vcombine.high %v571_v19, %v571_v19  ;;  %vm682_vm10 = vcmp.ge.s32.totalorder %v654_v53, 0  ;;  %s1282_s18 = scalar_lea.hbm %s1350_s6, %s899_s11  ;;  %s994_s14 = scalar_lea.vmem %s1276_s23, 512 }
  0x41   : > { %358 = vrot.lane.b32.xlu0 %v349_v11, %s1093_s15  ;;  %v357_v14 = vcombine.high %v349_v11, %v349_v11  ;;  %v356_v15 = vrot.slane %v342_v12, %v348_v5  ;;  %v657_v57 = vadd.s32 4294967295, %v655_v54  ;;  %vm658_vm4 = vcmp.ge.s32.totalorder %v656_v55, 0  ;;  %p995_p11 = scmp.ne.s32.totalorder %s1276_s23, %s994_s14  ;;  %p1001_p2 = scmp.lt.s32.totalorder %s1276_s23, %s999_s10 }
  0x42   : > { %v589_v24 = vcombine.high %v581_v22, %v581_v22  ;;  %v588_v25 = vrot.slane %v574_v23, %v348_v5  ;;  %vm660_vm5 = vcmp.lt.s32.totalorder %v656_v55, 16  ;;  %vm684_vm11 = vcmp.lt.s32.totalorder %v654_v53, 16  ;;  %p1002_p8 = scmp.lt.s32.totalorder %s1000_s8, %s994_s14 }
  0x43   : > { %362 = vrot.lane.b32.xlu1 %v356_v15, %s1093_s15  ;;  %vm659_vm6 = vcmp.ge.s32.totalorder %v657_v57, 0  ;;  %vm661_vm7 = vcmp.lt.s32.totalorder %v657_v57, 16  ;;  %vm662_vm8 = vmand %vm658_vm4, %vm660_vm5  ;;  %vm683_vm12 = vcmp.ge.s32.totalorder %v655_v54, 0  ;;  %vm685_vm13 = vcmp.lt.s32.totalorder %v655_v54, 16  ;;  %p996_p13 = pnand %p995_p11, %p1362_p12 }
  0x44   : > { %vm663_vm9 = vmand %vm659_vm6, %vm661_vm7  ;;  %v885_v0 = vsel %vm662_vm8, 1.0, %v1095_v63  ;;  %p1003_p9 = por %p1002_p8, %p1001_p2 }
  0x45   : > { %360 = vrot.lane.b32.xlu0 %v357_v14, %s1093_s15  ;;  %v886_v4 = vsel %vm663_vm9, 1.0, %v1095_v63  ;;  %vm686_vm14 = vmand %vm682_vm10, %vm684_vm11  ;;  %p997_p0 = pneg %p996_p13 }
  0x46   : > { %vm687_vm15 = vmand %vm683_vm12, %vm685_vm13  ;;  %v887_v11 = vsel %vm686_vm14, 1.0, %v1095_v63 }
  0x47   : > { %507 = vrot.lane.b32.xlu1 %v498_v16, %s1093_s15  ;;  %v888_v19 = vsel %vm687_vm15, 1.0, %v1095_v63  ;;  %p1004_p1 = pnand %p1003_p9, %p997_p0 }
  0x49   : > { %509 = vrot.lane.b32.xlu0 %v506_v20, %s1093_s15 }
  0x4b   : > { %511 = vrot.lane.b32.xlu1 %v505_v21, %s1093_s15 }
  0x4d   : > { %590 = vrot.lane.b32.xlu0 %v581_v22, %s1094_s16 }
  0x4f   : > { %592 = vrot.lane.b32.xlu1 %v589_v24, %s1094_s16 }
  0x51   : > { %594 = vrot.lane.b32.xlu0 %v588_v25, %s1094_s16  ;;  %s718_s16 = scalar_lea.sflag [#allocation4], %s1226_s29 }
  0xb3   : > { %v359_v26 = vpop.permute.xlu0 %358 }
  0xb5   : > { %v363_v27 = vpop.permute.xlu1 %362 }
  0xb7   : > { %v361_v28 = vpop.permute.xlu0 %360 }
  0xb8   : > { %v366_v29 = vsel %vm364_vm2, %v361_v28, %v363_v27  ;;  %v365_v30 = vsel %vm364_vm2, %v359_v26, %v361_v28 }
  0xb9   : > { %875 = vmatprep.subr.msk.bf16.mxu0 %vm371_vm0, %v366_v29  ;;  %v508_v31 = vpop.permute.xlu1 %507  ;;  %v373_v32 = vsel %vm371_vm0, %v365_v30, 0 }
  0xba   : > { %393 = vmatpush1.bf16.msra.mxu0 %v373_v32 }
  0xbb   : > { %v510_v34 = vpop.permute.xlu0 %509 }
  0xbc   : > { %v513_v35 = vsel %vm364_vm2, %v508_v31, %v510_v34 }
  0xbd   : > { %876 = vmatmul.mubr.msk.bf16.vlgmr.msra.gmra.mxu0 %vm367_vm1, %v964_v33  ;;  %v512_v36 = vpop.permute.xlu1 %511  ;;  %v519_v38 = vsel %vm371_vm0, %v513_v35, 0 }
  0xbe   : > { %v514_v37 = vsel %vm364_vm2, %v510_v34, %v512_v36  ;;  %556 = vmatprep.mubr.bf16.mxu0 %v1092_v6 }
  0xbf   : > { %v591_v39 = vpop.permute.xlu0 %590  ;;  %881 = vmatprep.subr.msk.bf16.mxu0 %vm371_vm0, %v514_v37 }
  0xc0   : > { %539 = vmatpush1.bf16.msra.mxu0 %v519_v38 }
  0xc1   : > { %v593_v40 = vpop.permute.xlu1 %592 }
  0xc2   : > { %v597_v42 = vsel %vm596_vm3, %v591_v39, %v593_v40 }
  0xc3   : > { %v595_v43 = vpop.permute.xlu0 %594  ;;  %v603_v45 = vsel %vm371_vm0, %v597_v42, 0 }
  0xc4   : > { %v598_v44 = vsel %vm596_vm3, %v593_v40, %v595_v43 }
  0xc5   : > { %882 = vmatmul.mubr.msk.bf16.vlgmr.msra.gmra.mxu0 %vm367_vm1, %v965_v41  ;;  %883 = vmatprep.subr.msk.bf16.mxu1 %vm371_vm0, %v598_v44 }
  0xc6   : > { %623 = vmatpush1.bf16.msra.mxu1 %v603_v45 }
  0xc9   : > { %884 = vmatmul.mubr.msk.bf16.vlgmr.msra.gmra.mxu1 %vm367_vm1, %v572_v46 }
  0xff   : > { %v473_v47 = vpop.f32.mrf.mxu1 }
 0x101   : > { %v475_v48 = vpop.f32.mrf.mxu1 }
 0x103   : > { %v477_v49 = vpop.f32.mrf.mxu1 }
 0x105   : > { %v478_v50 = vpop.f32.mrf.mxu1 }
 0x17d   : > { %v412_v56 = vpop.f32.mrf.mxu0 }
 0x17e   : > { %v474_v61 = vadd.f32 %v473_v47, %v412_v56 }
 0x17f   : > { %v414_v58 = vpop.f32.mrf.mxu0 }
 0x180   : > { %v476_v1 = vadd.f32 %v475_v48, %v414_v58 }
 0x181   : > { %v416_v59 = vpop.f32.mrf.mxu0 }
 0x183   : > { %v418_v60 = vpop.f32.mrf.mxu0 }
 0x185   : > { %v558_v62 = vpop.f32.mrf.mxu0 }
 0x186   : > { %v567_v2 = vadd.f32 %v558_v62, %v474_v61 }
 0x187   : > { %v560_v3 = vpop.f32.mrf.mxu0 }
 0x188   : > { %v668_v5 = vmul.f32 %v885_v0, %v567_v2  ;;  %v568_v6 = vadd.f32 %v560_v3, %v476_v1 }
 0x189   : > { %v562_v7 = vpop.f32.mrf.mxu0  ;;  %v642_v8 = vpop.f32.mrf.mxu1 }
 0x18a   : > { %670 = vst [vmem:[%s1269_s22] sm:$0xff] %v668_v5  ;;  %v669_v9 = vmul.f32 %v886_v4, %v568_v6  ;;  %v569_v10 = vadd.f32 %v562_v7, %v416_v59  ;;  %v676_v14 = vmul.f32 %v668_v5, %v668_v5 }
 0x18b   : > { %v564_v12 = vpop.f32.mrf.mxu0  ;;  %v644_v13 = vpop.f32.mrf.mxu1 }
 0x18c   : > { %671 = vst [vmem:[%s1269_s22 + $0x8] sm:$0xff] %v669_v9  ;;  %v649_v15 = vadd.f32 %v642_v8, %v569_v10  ;;  %v570_v16 = vadd.f32 %v564_v12, %v418_v60  ;;  %v672_v17 = vadd.f32 %v669_v9, %v668_v5  ;;  %v677_v18 = vmul.f32 %v669_v9, %v669_v9 }
 0x18d   : > { %v646_v20 = vpop.f32.mrf.mxu1 }
 0x18e   : > { %v692_v21 = vmul.f32 %v887_v11, %v649_v15  ;;  %v650_v22 = vadd.f32 %v644_v13, %v570_v16  ;;  %673 = vadd.xlane.f32.xlu1 %v672_v17  ;;  %v678_v23 = vadd.f32 %v677_v18, %v676_v14 }
 0x18f   : > { %v647_v24 = vpop.f32.mrf.mxu1 }
 0x190   : > { %889 = vst [vmem:[%s1269_s22 + $0x10] sm:$0xff] %v692_v21  ;;  %v693_v25 = vmul.f32 %v888_v19, %v650_v22  ;;  %679 = vadd.xlane.f32.xlu0 %v678_v23  ;;  %v701_v27 = vmul.f32 %v692_v21, %v692_v21 }
 0x192   : > { %890 = vst [vmem:[%s1269_s22 + $0x18] sm:$0xff] %v693_v25  ;;  %v697_v26 = vadd.f32 %v693_v25, %v692_v21  ;;  %v702_v28 = vmul.f32 %v693_v25, %v693_v25 }
 0x194   : > { %698 = vadd.xlane.f32.xlu0 %v697_v26  ;;  %v703_v29 = vadd.f32 %v702_v28, %v701_v27 }
 0x196   : > { %704 = vadd.xlane.f32.xlu1 %v703_v29 }
 0x197   : > { %1007 = shalt.err (!%p1004_p1)
}
 0x198   : > { %s1008_s9 = scalar_lea.hbm %s1282_s18, 512  ;;  %s1012_s22 = scalar_lea.hbm %s1350_s6, 2048 }
 0x199   : > { %p1009_p3 = scmp.ne.s32.totalorder %s1282_s18, %s1008_s9  ;;  %p1013_p7 = scmp.lt.s32.totalorder %s1282_s18, %s1350_s6 }
 0x19a   : > { %p1014_p6 = scmp.lt.s32.totalorder %s1012_s22, %s1008_s9 }
 0x19b   : > { %p1010_p4 = pnand %p1009_p3, %p1362_p12 }
 0x19c   : > { %p1015_p10 = por %p1014_p6, %p1013_p7 }
 0x19d   : > { %p1011_p5 = pneg %p1010_p4 }
 0x19f   : > { %p1016_p11 = pnand %p1015_p10, %p1011_p5 }
 0x1a1   : > { %1019 = shalt.err (!%p1016_p11)
}
 0x1a2   : > { %s1097_s17 = smov 256   ;;  %s1098_s14 = smov 1024   ;;  %vm707_vm0 = vcmp.eq.s32.totalorder %v1264_v51, 0  ;;  %vm711_vm1 = vcmp.eq.s32.totalorder %v1264_v51, 1 }
 0x1a3   : > { %s1099_s21 = smov 16   ;;  %s872_s10 = sshll.u32 %s1226_s29, 3 }
 0x1a4   : > { %904 = dma.vmem_to_hbm [thread:$0]  (%p1362_p12), %s1276_s23, 512, %s1282_s18, %s718_s16, %s1097_s17, %s1098_s14, %s1099_s21  }
 0x1a5   : > { %s895_s8 = sshll.u32 %s1162_s28, 7  ;;  %s321_s9 = scalar_lea.vmem [#allocation6], %s872_s10 }
 0x1a6   : > { %s752_s19 = sshll.u32 %s321_s9, 4  ;;  %s750_s16 = scalar_lea.hbm %s1351_s7, %s895_s8  ;;  %s753_s19 = int_to_ptr.vmem [resolvable:$true] %s752_s19 }
 0x1a7   : > { %s723_s20 = scalar_lea.sflag [#allocation7], %s1226_s29  ;;  %s1020_s22 = scalar_lea.vmem %s753_s19, 128 }
 0x1a8   : > { %p1021_p13 = scmp.ne.s32.totalorder %s753_s19, %s1020_s22  ;;  %s1100_s11 = smov [#allocation6]  }
 0x1a9   : > { %s1024_s15 = sshll.u32 %s1100_s11, 4  ;;  %s1025_s15 = int_to_ptr.vmem [resolvable:$false] %s1024_s15 }
 0x1aa   : > { %p1022_p0 = pnand %p1021_p13, %p1362_p12  ;;  %s1026_s28 = scalar_lea.vmem %s1025_s15, 256 }
 0x1ab   : > { %p1027_p8 = scmp.lt.s32.totalorder %s753_s19, %s1025_s15  ;;  %p1028_p9 = scmp.lt.s32.totalorder %s1026_s28, %s1020_s22 }
 0x1ac   : > { %p1023_p2 = pneg %p1022_p0 }
 0x1ad   : > { %p1029_p1 = por %p1028_p9, %p1027_p8 }
 0x1af   : > { %p1030_p3 = pnand %p1029_p1, %p1023_p2 }
 0x217   : > { %v674_v31 = vpop.xlane.xlu1 %673 }
 0x219   : > { %v680_v30 = vpop.xlane.xlu0 %679 }
 0x21d   : > { %v699_v32 = vpop.xlane.xlu0 %698 }
 0x21e   : > { %v700_v33 = vadd.f32 %v699_v32, %v674_v31 }
 0x21f   : > { %v705_v34 = vpop.xlane.xlu1 %704 }
 0x220   : > { %v706_v35 = vadd.f32 %v705_v34, %v680_v30  ;;  %v710_v36 = vsel %vm707_vm0, %v700_v33, 0.0 }
 0x222   : > { %v714_v37 = vsel %vm711_vm1, %v706_v35, 0.0 }
 0x223   : > { %v715_v38 = vadd.f32 %v714_v37, %v710_v36 }
 0x225   : > { %716 = vst [vmem:[%s321_s9] sm:$0xff] %v715_v38 }
 0x226   : > { %1033 = shalt.err (!%p1030_p3)
}
 0x227   : > { %s1034_s17 = scalar_lea.hbm %s750_s16, 128  ;;  %s1038_s21 = scalar_lea.hbm %s1351_s7, 512 }
 0x228   : > { %p1035_p4 = scmp.ne.s32.totalorder %s750_s16, %s1034_s17  ;;  %p1039_p6 = scmp.lt.s32.totalorder %s750_s16, %s1351_s7 }
 0x229   : > { %p1040_p10 = scmp.lt.s32.totalorder %s1038_s21, %s1034_s17 }
 0x22a   : > { %p1036_p5 = pnand %p1035_p4, %p1362_p12 }
 0x22b   : > { %p1041_p11 = por %p1040_p10, %p1039_p6 }
 0x22c   : > { %p1037_p7 = pneg %p1036_p5 }
 0x22e   : > { %p1042_p13 = pnand %p1041_p11, %p1037_p7 }
 0x230   : > { %1045 = shalt.err (!%p1042_p13)
}
 0x231   : > { %905 = dma.vmem_to_hbm [thread:$0]  (%p1362_p12), %s753_s19, 128, %s750_s16, %s723_s20  }
 0x232 PF: > { %p920_p0 = scmp.ge.s32.totalorder %s1088_s27, 2  ;;  %s764_s9 = sand.u32 1, %s1076_s24  }
 0x233   : > { %p1363_p2 = scmp.ne.s32.totalorder %s1357_s13, 0  ;;  %s765_s23 = scalar_lea.sflag [#allocation4], %s764_s9 }
 0x235   : > { %p913_p8 = pnand %p920_p0, %p1363_p2 }
 0x237   : > { %p914_p9 = pneg %p913_p8 }
 0x239   : > { %1067 = dma.done.wait (%p914_p9), %s765_s23, 512  }
 0x23a   : > { %1069 = vsyncadd (%p914_p9), %s765_s23, 4294966784  ;;  %s774_s18 = scalar_lea.sflag [#allocation7], %s764_s9 }
 0x23b   : > { %1071 = dma.done.wait (%p914_p9), %s774_s18, 128  }
 0x23c   : > { %1073 = vsyncadd (%p914_p9), %s774_s18, 4294967168  ;;  %s1364_s12 = sld [smem:[#allocation11_spill]]  ;;  %p24_p12 = scmp.ge.s32.totalorder %s1166_s30, 6  }
 0x23d   : > { %s1365_s24 = smov %s1080_s25  ;;  %s1366_s25 = smov %s1084_s26 }
 0x23e   : > { %s1368_s27 = smov %s1166_s30  ;;  %26 = sbr.rel (!%p24_p12) target bundleno = 7 (0x7), region = 110 }
 0x242   : > { %s1367_s26 = smov %s1364_s12 }
 0x243   :  { %779 = vsyncpa [#allocation3], 1 }
 0x244   :  { %781 = vsyncpa [#allocation3 + $0x1], 1 }
 0x245   :  { %782 = vsyncpa [#allocation4], 1 }
 0x246   :  { %784 = vsyncpa [#allocation4 + $0x1], 1 }
 0x247   :  { %785 = vsyncpa [#allocation7], 1 }
 0x248   :  { %787 = vsyncpa [#allocation7 + $0x1], 1 }

</bundles_post_ra>
